<compile_context>
chip_gen: v7x
topology: tpu7x:2x2x1
jax: 0.10.0
libtpu: 0.0.40
codegen_flags: <defaults>
</compile_context>

<pallas_src>
import jax
import jax.numpy as jnp
from jax.experimental import pallas as pl
from jax.experimental.pallas import tpu as pltpu


# ----------------------------------------------------------------------------
# Buffer setup (plain JAX glue) -- matches the torch __init__ of the spec exactly,
# including its non-standard div_term = 1 / 10000 ** (2 * arange(d_model) / d_model)
# with sin taking div_term[0::2] and cos taking div_term[1::2].
# ----------------------------------------------------------------------------
def make_positional_encoding(d_model: int, max_len: int = 5000,
                             dtype=jnp.float32) -> jax.Array:
    position = jnp.arange(max_len, dtype=jnp.float32)[:, None]              # (max_len, 1)
    div_term = 1.0 / (10000.0 ** (2.0 * jnp.arange(d_model, dtype=jnp.float32)
                                  / float(d_model)))                        # (d_model,)
    pe = jnp.zeros((max_len, d_model), dtype=jnp.float32)
    pe = pe.at[:, 0::2].set(jnp.sin(position * div_term[0::2]))
    pe = pe.at[:, 1::2].set(jnp.cos(position * div_term[1::2]))
    return pe.astype(dtype)                                                  # (max_len, d_model)


# ----------------------------------------------------------------------------
# Kernel bodies
# ----------------------------------------------------------------------------
def _pe_add_kernel(x_ref, pe_ref, o_ref):
    # x_ref: (ts, B, D)   pe_ref: (ts, D)   o_ref: (ts, B, D)
    o_ref[...] = x_ref[...] + pe_ref[...][:, None, :]


def _embed_pe_kernel(src_ref, w_ref, peb_ref, o_ref):
    # src_ref: (ts, B, 1)  w_ref: (1, D)  peb_ref: (ts, D) [pe + bias]  o_ref: (ts, B, D)
    o_ref[...] = src_ref[...] * w_ref[...][None, :, :] + peb_ref[...][:, None, :]


# ----------------------------------------------------------------------------
# Tiling / VMEM helpers
# ----------------------------------------------------------------------------
_DEFAULT_TILE_BUDGET_BYTES = 4 * 1024 * 1024   # padded live-tile bytes per grid step
_MIN_GRID_STEPS = 4                            # >= 2 x TensorCores (v7x) for pipelining


def _round_up(x: int, m: int) -> int:
    return ((x + m - 1) // m) * m


def _sublane_pack(dtype) -> int:
    # elements per packed sublane tile on the second-to-minor dim:
    # f32 -> 8, bf16 -> 16, int8/fp8 -> 32
    itemsize = jnp.dtype(dtype).itemsize
    return 8 * max(1, 4 // itemsize)


def _pick_seq_tile(S: int, bytes_per_seq_row: int, sub: int,
                   tile_budget_bytes: int) -> int:
    ts = min(max(1, tile_budget_bytes // bytes_per_seq_row),
             max(1, S // _MIN_GRID_STEPS))
    if ts >= S:
        return int(S)
    ts = max(sub, (ts // sub) * sub)   # align pe's sublane dim to the dtype packing
    return int(S) if ts >= S else int(ts)


def _vmem_limit_bytes(tile_bytes_padded: int) -> int:
    cap = 64 << 20                      # conservative (v7x per-TC) fallback
    try:
        info_cap = int(pltpu.get_tpu_info().vmem_capacity_bytes)
        if info_cap >= (32 << 20):
            cap = info_cap
    except Exception:
        pass
    want = 2 * tile_bytes_padded + (2 << 20)       # double-buffered + slack
    return int(min(max(want, 16 << 20), (cap * 8) // 10))


# ----------------------------------------------------------------------------
# 1) Standalone PositionalEncoding.forward:  x + pe[:S] broadcast over batch
# ----------------------------------------------------------------------------
def positional_encoding_forward(x: jax.Array, pe: jax.Array,
                                *, tile_budget_bytes: int = _DEFAULT_TILE_BUDGET_BYTES
                                ) -> jax.Array:
    """x: (S, B, D), pe: (max_len, D)  ->  (S, B, D) = x + pe[:S] broadcast over B."""
    S, B, D = x.shape
    max_len, d_model = pe.shape
    if d_model != D:
        raise ValueError(f"pe feature dim {d_model} != x feature dim {D}")
    if max_len < S:
        raise ValueError(f"sequence length {S} exceeds pe table max_len {max_len}")

    pe_s = pe[:S]
    if pe_s.dtype != x.dtype:            # only cast on mismatch (pe built in model dtype)
        pe_s = pe_s.astype(x.dtype)

    itemsize = jnp.dtype(x.dtype).itemsize
    sub = _sublane_pack(x.dtype)
    lane_d = _round_up(D, 128)
    # PADDED live bytes per sequence row: x row + out row + pe row
    bytes_per_row = (2 * _round_up(B, sub) + 1) * lane_d * itemsize
    ts = _pick_seq_tile(S, bytes_per_row, sub, tile_budget_bytes)
    grid = (pl.cdiv(S, ts),)             # clipped/padded final block if ts doesn't divide S
    vmem_limit = _vmem_limit_bytes(ts * bytes_per_row)

    return pl.pallas_call(
        _pe_add_kernel,
        out_shape=jax.ShapeDtypeStruct((S, B, D), x.dtype),
        grid=grid,
        in_specs=[
            pl.BlockSpec((ts, B, D), lambda i: (i, 0, 0)),   # x tile
            pl.BlockSpec((ts, D), lambda i: (i, 0)),         # matching pe rows
        ],
        out_specs=pl.BlockSpec((ts, B, D), lambda i: (i, 0, 0)),
        compiler_params=pltpu.CompilerParams(
            dimension_semantics=("parallel",),               # megacore sharding on v7x
            vmem_limit_bytes=vmem_limit,
        ),
    )(x, pe_s)


# ----------------------------------------------------------------------------
# 2) Fused TransAm front end:  pos_encoder(input_embedding(src))
#    out = src * weight + bias + pe[:S]   (bias folded into pe in the wrapper)
# ----------------------------------------------------------------------------
def input_embedding_plus_pe(src: jax.Array, weight: jax.Array, bias: jax.Array,
                            pe: jax.Array,
                            *, tile_budget_bytes: int = _DEFAULT_TILE_BUDGET_BYTES
                            ) -> jax.Array:
    """src: (S, B, 1), weight: (D,) or (D,1), bias: (D,), pe: (max_len, D) -> (S, B, D)."""
    S, B, one = src.shape
    if one != 1:
        raise ValueError("input_embedding expects a trailing feature dim of 1")
    w = weight.reshape(-1)
    D = w.shape[0]
    max_len, d_model = pe.shape
    if d_model != D:
        raise ValueError("pe table feature dim does not match embedding width")
    if max_len < S:
        raise ValueError(f"sequence length {S} exceeds pe table max_len {max_len}")

    dtype = src.dtype
    # Fold bias into the pe rows once (S x D, negligible vs. the S x B x D output).
    peb = (pe[:S].astype(jnp.float32) + bias.astype(jnp.float32)[None, :]).astype(dtype)
    w2d = w.astype(dtype).reshape(1, D)

    itemsize = jnp.dtype(dtype).itemsize
    sub = _sublane_pack(dtype)
    lane_d = _round_up(D, 128)
    # PADDED live bytes per seq row: out row + src row (lane-padded to 128) + pe row
    bytes_per_row = (_round_up(B, sub) * (lane_d + 128) + lane_d) * itemsize
    ts = _pick_seq_tile(S, bytes_per_row, sub, tile_budget_bytes)
    grid = (pl.cdiv(S, ts),)
    vmem_limit = _vmem_limit_bytes(ts * bytes_per_row)

    return pl.pallas_call(
        _embed_pe_kernel,
        out_shape=jax.ShapeDtypeStruct((S, B, D), dtype),
        grid=grid,
        in_specs=[
            pl.BlockSpec((ts, B, 1), lambda i: (i, 0, 0)),   # raw scalar features
            pl.BlockSpec((1, D), lambda i: (0, 0)),          # embedding weight (row)
            pl.BlockSpec((ts, D), lambda i: (i, 0)),         # pe + bias rows
        ],
        out_specs=pl.BlockSpec((ts, B, D), lambda i: (i, 0, 0)),
        compiler_params=pltpu.CompilerParams(
            dimension_semantics=("parallel",),
            vmem_limit_bytes=vmem_limit,
        ),
    )(src, w2d, peb)


# ----------------------------------------------------------------------------
# Demo / self-check (small shapes; max_len >= every S used)
# ----------------------------------------------------------------------------
if __name__ == "__main__":
    d_model = 32
    max_len = 128
    batch = 2
    key = jax.random.PRNGKey(0)

    pe_f32 = make_positional_encoding(d_model, max_len)                       # f32 table
    pe_bf16 = make_positional_encoding(d_model, max_len, dtype=jnp.bfloat16)  # model-dtype table

    # Case 1: standalone PE add, default budget -> grid of >= 4 steps.
    S1 = 96
    x1 = jax.random.normal(jax.random.fold_in(key, 0), (S1, batch, d_model), jnp.float32)
    ref1 = x1 + pe_f32[:S1][:, None, :]
    out1 = jax.block_until_ready(positional_encoding_forward(x1, pe_f32))
    assert out1.shape == (S1, batch, d_model)
    assert jnp.allclose(out1, ref1, atol=1e-6, rtol=1e-6)

    # Case 2: ragged S with a tiny tile budget -> multi-block grid, clipped final block.
    S2 = 50
    x2 = jax.random.normal(jax.random.fold_in(key, 1), (S2, batch, d_model), jnp.float32)
    ref2 = x2 + pe_f32[:S2][:, None, :]
    out2 = jax.block_until_ready(
        positional_encoding_forward(x2, pe_f32, tile_budget_bytes=72 * 1024))
    assert out2.shape == (S2, batch, d_model)
    assert jnp.allclose(out2, ref2, atol=1e-6, rtol=1e-6)

    # Case 3: bf16 activations, pe built in the model dtype (16-sublane packing path).
    S3 = 96
    x3 = jax.random.normal(jax.random.fold_in(key, 2), (S3, batch, d_model),
                           jnp.float32).astype(jnp.bfloat16)
    ref3 = (x3 + pe_bf16[:S3][:, None, :]).astype(jnp.float32)
    out3 = jax.block_until_ready(positional_encoding_forward(x3, pe_bf16))
    assert out3.dtype == jnp.bfloat16
    assert jnp.allclose(out3.astype(jnp.float32), ref3, atol=1e-2, rtol=1e-2)

    # Case 4: fused input_embedding + PE (review item #1: kill the standalone round trip).
    S4 = 64
    src = jax.random.normal(jax.random.fold_in(key, 3), (S4, batch, 1), jnp.float32)
    w = jax.random.uniform(jax.random.fold_in(key, 4), (d_model,), jnp.float32,
                           minval=-0.1, maxval=0.1)
    b = jax.random.uniform(jax.random.fold_in(key, 5), (d_model,), jnp.float32,
                           minval=-0.1, maxval=0.1)
    ref4 = src * w[None, None, :] + b[None, None, :] + pe_f32[:S4][:, None, :]
    out4 = jax.block_until_ready(input_embedding_plus_pe(src, w, b, pe_f32))
    assert out4.shape == (S4, batch, d_model)
    assert jnp.allclose(out4, ref4, atol=1e-5, rtol=1e-5)

    print("KERNEL_OK")
</pallas_src>

<mosaic_0001>
module attributes {stable_mosaic.version = 11 : i64} {
  func.func @_pe_add_kernel(%arg0: i32, %arg1: memref<24x2x32xf32, #tpu.memory_space<vmem>>, %arg2: memref<24x32xf32, #tpu.memory_space<vmem>>, %arg3: memref<24x2x32xf32, #tpu.memory_space<vmem>>) attributes {dimension_semantics = [#tpu.dimension_semantics<parallel>], iteration_bounds = array<i64: 4>, scalar_prefetch = 0 : i64, scratch_operands = 0 : i64, tpu.core_type = #tpu.core_type<tc>, window_params = [{transform_indices = @transform_0, window_bounds = array<i64: 24, 2, 32>}, {transform_indices = @transform_1, window_bounds = array<i64: 24, 32>}, {transform_indices = @transform_2, window_bounds = array<i64: 24, 2, 32>}]} {
    %c0 = arith.constant 0 : index
    %c0_0 = arith.constant 0 : index
    %c0_1 = arith.constant 0 : index
    %0 = vector.load %arg1[%c0, %c0_0, %c0_1] : memref<24x2x32xf32, #tpu.memory_space<vmem>>, vector<24x2x32xf32>
    %c0_2 = arith.constant 0 : index
    %c0_3 = arith.constant 0 : index
    %1 = vector.load %arg2[%c0_2, %c0_3] : memref<24x32xf32, #tpu.memory_space<vmem>>, vector<24x32xf32>
    %2 = vector.shape_cast %1 : vector<24x32xf32> to vector<24x1x32xf32>
    %3 = vector.broadcast %2 : vector<24x1x32xf32> to vector<24x2x32xf32>
    %4 = arith.addf %0, %3 : vector<24x2x32xf32>
    %c0_4 = arith.constant 0 : index
    %c0_5 = arith.constant 0 : index
    %c0_6 = arith.constant 0 : index
    %5 = vector.load %arg3[%c0_4, %c0_5, %c0_6] : memref<24x2x32xf32, #tpu.memory_space<vmem>>, vector<24x2x32xf32>
    tpu.vector_store %arg3[%c0_4, %c0_5, %c0_6], %4 {strides = array<i32>} : memref<24x2x32xf32, #tpu.memory_space<vmem>>, vector<24x2x32xf32>,
    return
  }
  func.func @transform_0(%arg0: i32) -> (i32, i32, i32) {
    %c0_i32 = arith.constant 0 : i32
    %c0_i32_0 = arith.constant 0 : i32
    %c0_i32_1 = arith.constant 0 : i32
    return %arg0, %c0_i32, %c0_i32_0 : i32, i32, i32
  }
  func.func @transform_1(%arg0: i32) -> (i32, i32) {
    %c0_i32 = arith.constant 0 : i32
    %c0_i32_0 = arith.constant 0 : i32
    return %arg0, %c0_i32 : i32, i32
  }
  func.func @transform_2(%arg0: i32) -> (i32, i32, i32) {
    %c0_i32 = arith.constant 0 : i32
    %c0_i32_0 = arith.constant 0 : i32
    %c0_i32_1 = arith.constant 0 : i32
    return %arg0, %c0_i32, %c0_i32_0 : i32, i32, i32
  }
}

</mosaic_0001>

<bundles_post_ra>
// kernel: tpu_custom_call.1
= control target key start
LH: loop header
LB: loop body
LE: loop exit
PB: predicated region body
PF: predicated region fallthrough
CT: control target
= control target key end

     0   :  { %s626_s9 = smov 0   ;;  %s773_s0 = inlined_call_operand.vmem [shape: f32[96,2,32], index: 0, kind: input, shape index: {}]   ;;  %s774_s1 = inlined_call_operand.vmem [shape: f32[96,32], index: 1, kind: input, shape index: {}]   ;;  %s775_s2 = inlined_call_operand.vmem [shape: f32[96,2,32], index: 2, kind: output, shape index: {}]  }
   0x1 LB: > { %s583_s10 = sadd.s32 4294967295, %s608_s9   ;;  %p587_p0 = scmp.ge.s32.totalorder %s608_s9, 1  ;;  %s608_s9 = sphi %s626_s9, %s12_s9  }
   0x2   : > { %p124_p1 = scmp.lt.s32.totalorder %s608_s9, 5 }
   0x4   : > { %p125_p2 = pnand %p587_p0, %p124_p1 }
   0x5   : > { %s151_s11 = smul.u32 (!%p125_p2), 24, %s583_s10  ;;  %v203_v0 = vlaneseq (!%p125_p2)  ;;  %v610_v1 = vmov (!%p125_p2), 1966171168   ;;  %vm490_vm0 = vcmask (!%p125_p2), 254976  }
   0x6   : > { %128 = sbr.rel (%p125_p2) target bundleno = 46 (0x2e), region = 28  ;;  %v201_v2 = vunpack.c.l.s4 (!%p125_p2), %v610_v1 }
   0x7   : > { %s157_s12 = smul.u32 (!%p125_p2), 3, %s583_s10  ;;  %p152_p3 = scmp.lt.s32.totalorder (!%p125_p2), %s151_s11, 95  ;;  %v204_v3 = vshrl.u32 (!%p125_p2), %v203_v0, 7 }
   0x8   : > { %v202_v4 = vunpack.c.0.s8 (!%p125_p2), %v201_v2 }
   0x9   : > { %p158_p4 = scmp.lt.s32.totalorder (!%p125_p2), %s157_s12, 11  ;;  %v648_v8 = vsub.s32 (!%p125_p2), 0, %v204_v3 }
   0xa   : > { %v634_v5 = vsub.s32 (!%p125_p2), %v202_v4, %v204_v3 }
   0xd   : > { %s777_s11 = smov (!%p152_p3, %s151_s11), 95  ;;  %s779_s12 = smov (!%p158_p4, %s157_s12), 11 }
   0xe   : > { %s588_s13 = sshll.u32 %s777_s11, 1  ;;  %s589_s14 = sshll.u32 %s779_s12, 3 }
   0xf   : > { %s639_s17 = scalar_lea.vmem %s774_s1, %s589_s14  ;;  %s645_s20 = scalar_lea.vmem %s773_s0, %s588_s13 }
  0x10   : > { %v193_v6 = vld [vmem:[%s639_s17] sm:$0xff]  ;;  %v194_v10 = vld [vmem:[%s639_s17 + $0x8] sm:$0xff]  ;;  %s661_s23 = scalar_lea.vmem %s775_s2, %s588_s13  ;;  %v177_v36 = vld [vmem:[%s645_s20 + $0x10] sm:$0x3] }
  0x11   : > { %v206_v7 = vrot.slane %v193_v6, %v634_v5  ;;  %v199_v9 = vcombine.high %v193_v6, %v193_v6  ;;  %v255_v14 = vrot.slane %v194_v10, %v634_v5  ;;  %v169_v15 = vld [vmem:[%s645_s20] sm:$0x3]  ;;  %v248_v16 = vcombine.high %v194_v10, %v194_v10  ;;  %v170_v21 = vld [vmem:[%s645_s20 + $0x2] sm:$0x3]  ;;  %v171_v22 = vld [vmem:[%s645_s20 + $0x4] sm:$0x3] }
  0x12   : > { %v173_v31 = vld [vmem:[%s645_s20 + $0x8] sm:$0x3]  ;;  %v172_v32 = vld [vmem:[%s645_s20 + $0x6] sm:$0x3]  ;;  %v174_v41 = vld [vmem:[%s645_s20 + $0xa] sm:$0x3] }
  0x13   : > { %v222_v11 = vrot.slane %v206_v7, %v634_v5  ;;  %v214_v12 = vcombine.high %v206_v7, %v206_v7  ;;  %v213_v13 = vrot.slane %v199_v9, %v634_v5  ;;  %v271_v24 = vrot.slane %v255_v14, %v634_v5  ;;  %v175_v42 = vld [vmem:[%s645_s20 + $0xc] sm:$0x3]  ;;  %v178_v48 = vld [vmem:[%s645_s20 + $0x12] sm:$0x3]  ;;  %v176_v50 = vld [vmem:[%s645_s20 + $0xe] sm:$0x3] }
  0x14   : > { %v263_v25 = vcombine.high %v255_v14, %v255_v14  ;;  %v262_v26 = vrot.slane %v248_v16, %v634_v5  ;;  %v195_v54 = vld [vmem:[%s639_s17 + $0x10] sm:$0xff]  ;;  %v181_v3 = vld [vmem:[%s645_s20 + $0x18] sm:$0x3]  ;;  %v183_v14 = vld [vmem:[%s645_s20 + $0x1c] sm:$0x3] }
  0x15   : > { %v349_v17 = vrot.slane %v222_v11, %v648_v8  ;;  %v236_v18 = vrot.slane %v214_v12, %v634_v5  ;;  %v244_v19 = vcombine.high %v222_v11, %v222_v11  ;;  %v229_v20 = vrot.slane %v213_v13, %v634_v5  ;;  %v179_v58 = vld [vmem:[%s645_s20 + $0x14] sm:$0x3]  ;;  %v180_v62 = vld [vmem:[%s645_s20 + $0x16] sm:$0x3] }
  0x16   : > { %v215_v23 = vcombine.high %v213_v13, %v213_v13  ;;  %v381_v37 = vrot.slane %v271_v24, %v648_v8  ;;  %v285_v43 = vrot.slane %v263_v25, %v634_v5  ;;  %v293_v53 = vcombine.high %v271_v24, %v271_v24  ;;  %v182_v13 = vld [vmem:[%s645_s20 + $0x1a] sm:$0x3] }
  0x17   : > { %v466_v27 = vadd.f32 %v349_v17, %v169_v15  ;;  %v353_v28 = vrot.slane %v236_v18, %v648_v8  ;;  %v357_v29 = vrot.slane %v244_v19, %v648_v8  ;;  %v246_v30 = vcombine.high %v236_v18, %v236_v18 }
  0x18   : > { %v365_v33 = vrot.slane %v229_v20, %v648_v8  ;;  %v243_v34 = vrot.slane %v215_v23, %v634_v5  ;;  %v245_v35 = vcombine.high %v229_v20, %v229_v20  ;;  %v474_v51 = vadd.f32 %v381_v37, %v177_v36  ;;  %v184_v23 = vld [vmem:[%s645_s20 + $0x1e] sm:$0x3] }
  0x19   : > { %491 = vst.msk [vmem:[%s661_s23] sm:$0x3] %vm490_vm0, %v466_v27  ;;  %v467_v38 = vadd.f32 %v353_v28, %v170_v21  ;;  %v468_v39 = vadd.f32 %v357_v29, %v171_v22  ;;  %v361_v40 = vrot.slane %v246_v30, %v648_v8  ;;  %v385_v52 = vrot.slane %v285_v43, %v648_v8  ;;  %v185_v22 = vld [vmem:[%s645_s20 + $0x20] sm:$0x3] }
  0x1a   : > { %v470_v44 = vadd.f32 %v365_v33, %v173_v31  ;;  %v369_v45 = vrot.slane %v243_v34, %v648_v8  ;;  %v373_v46 = vrot.slane %v245_v35, %v648_v8  ;;  %v247_v47 = vcombine.high %v243_v34, %v243_v34  ;;  %499 = vst.msk [vmem:[%s661_s23 + $0x10] sm:$0x3] %vm490_vm0, %v474_v51  ;;  %v186_v31 = vld [vmem:[%s645_s20 + $0x22] sm:$0x3] }
  0x1b   : > { %492 = vst.msk [vmem:[%s661_s23 + $0x2] sm:$0x3] %vm490_vm0, %v467_v38  ;;  %493 = vst.msk [vmem:[%s661_s23 + $0x4] sm:$0x3] %vm490_vm0, %v468_v39  ;;  %v469_v49 = vadd.f32 %v361_v40, %v172_v32  ;;  %v295_v59 = vcombine.high %v285_v43, %v285_v43  ;;  %v475_v60 = vadd.f32 %v385_v52, %v178_v48  ;;  %v187_v32 = vld [vmem:[%s645_s20 + $0x24] sm:$0x3] }
  0x1c   : > { %495 = vst.msk [vmem:[%s661_s23 + $0x8] sm:$0x3] %vm490_vm0, %v470_v44  ;;  %v471_v55 = vadd.f32 %v369_v45, %v174_v41  ;;  %v472_v56 = vadd.f32 %v373_v46, %v175_v42  ;;  %v377_v57 = vrot.slane %v247_v47, %v648_v8  ;;  %v389_v61 = vrot.slane %v293_v53, %v648_v8  ;;  %v189_v38 = vld [vmem:[%s645_s20 + $0x28] sm:$0x3]  ;;  %v188_v40 = vld [vmem:[%s645_s20 + $0x26] sm:$0x3] }
  0x1d   : > { %494 = vst.msk [vmem:[%s661_s23 + $0x6] sm:$0x3] %vm490_vm0, %v469_v49  ;;  %v278_v63 = vrot.slane %v262_v26, %v634_v5  ;;  %v264_v0 = vcombine.high %v262_v26, %v262_v26  ;;  %v393_v2 = vrot.slane %v295_v59, %v648_v8  ;;  %v304_v4 = vrot.slane %v195_v54, %v634_v5  ;;  %v190_v47 = vld [vmem:[%s645_s20 + $0x2a] sm:$0x3]  ;;  %v191_v48 = vld [vmem:[%s645_s20 + $0x2c] sm:$0x3] }
  0x1e   : > { %496 = vst.msk [vmem:[%s661_s23 + $0xa] sm:$0x3] %vm490_vm0, %v471_v55  ;;  %497 = vst.msk [vmem:[%s661_s23 + $0xc] sm:$0x3] %vm490_vm0, %v472_v56  ;;  %v473_v1 = vadd.f32 %v377_v57, %v176_v50  ;;  %v297_v6 = vcombine.high %v195_v54, %v195_v54  ;;  %v476_v7 = vadd.f32 %v389_v61, %v179_v58  ;;  %v192_v53 = vld [vmem:[%s645_s20 + $0x2e] sm:$0x3] }
  0x1f   : > { %500 = vst.msk [vmem:[%s661_s23 + $0x12] sm:$0x3] %vm490_vm0, %v475_v60  ;;  %v397_v9 = vrot.slane %v278_v63, %v648_v8  ;;  %v292_v10 = vrot.slane %v264_v0, %v634_v5  ;;  %v294_v11 = vcombine.high %v278_v63, %v278_v63  ;;  %v477_v12 = vadd.f32 %v393_v2, %v180_v62 }
  0x20   : > { %498 = vst.msk [vmem:[%s661_s23 + $0xe] sm:$0x3] %vm490_vm0, %v473_v1  ;;  %v320_v15 = vrot.slane %v304_v4, %v634_v5  ;;  %v312_v16 = vcombine.high %v304_v4, %v304_v4  ;;  %v311_v17 = vrot.slane %v297_v6, %v634_v5  ;;  %501 = vst.msk [vmem:[%s661_s23 + $0x14] sm:$0x3] %vm490_vm0, %v476_v7 }
  0x21   : > { %v478_v18 = vadd.f32 %v397_v9, %v181_v3  ;;  %v401_v19 = vrot.slane %v292_v10, %v648_v8  ;;  %v405_v20 = vrot.slane %v294_v11, %v648_v8  ;;  %v296_v21 = vcombine.high %v292_v10, %v292_v10  ;;  %502 = vst.msk [vmem:[%s661_s23 + $0x16] sm:$0x3] %vm490_vm0, %v477_v12 }
  0x22   : > { %v413_v24 = vrot.slane %v320_v15, %v648_v8  ;;  %v334_v25 = vrot.slane %v312_v16, %v634_v5  ;;  %v342_v26 = vcombine.high %v320_v15, %v320_v15  ;;  %v327_v27 = vrot.slane %v311_v17, %v634_v5 }
  0x23   : > { %503 = vst.msk [vmem:[%s661_s23 + $0x18] sm:$0x3] %vm490_vm0, %v478_v18  ;;  %v479_v28 = vadd.f32 %v401_v19, %v182_v13  ;;  %v480_v29 = vadd.f32 %v405_v20, %v183_v14  ;;  %v409_v30 = vrot.slane %v296_v21, %v648_v8  ;;  %v313_v33 = vcombine.high %v311_v17, %v311_v17 }
  0x24   : > { %v482_v34 = vadd.f32 %v413_v24, %v185_v22  ;;  %v417_v35 = vrot.slane %v334_v25, %v648_v8  ;;  %v421_v36 = vrot.slane %v342_v26, %v648_v8  ;;  %v344_v37 = vcombine.high %v334_v25, %v334_v25 }
  0x25   : > { %504 = vst.msk [vmem:[%s661_s23 + $0x1a] sm:$0x3] %vm490_vm0, %v479_v28  ;;  %505 = vst.msk [vmem:[%s661_s23 + $0x1c] sm:$0x3] %vm490_vm0, %v480_v29  ;;  %v481_v39 = vadd.f32 %v409_v30, %v184_v23  ;;  %v429_v41 = vrot.slane %v327_v27, %v648_v8  ;;  %v341_v42 = vrot.slane %v313_v33, %v634_v5 }
  0x26   : > { %v343_v43 = vcombine.high %v327_v27, %v327_v27  ;;  %507 = vst.msk [vmem:[%s661_s23 + $0x20] sm:$0x3] %vm490_vm0, %v482_v34  ;;  %v483_v44 = vadd.f32 %v417_v35, %v186_v31  ;;  %v484_v45 = vadd.f32 %v421_v36, %v187_v32  ;;  %v425_v46 = vrot.slane %v344_v37, %v648_v8 }
  0x27   : > { %506 = vst.msk [vmem:[%s661_s23 + $0x1e] sm:$0x3] %vm490_vm0, %v481_v39  ;;  %v486_v49 = vadd.f32 %v429_v41, %v189_v38  ;;  %v433_v5 = vrot.slane %v341_v42, %v648_v8  ;;  %v345_v51 = vcombine.high %v341_v42, %v341_v42 }
  0x28   : > { %v437_v50 = vrot.slane %v343_v43, %v648_v8  ;;  %508 = vst.msk [vmem:[%s661_s23 + $0x22] sm:$0x3] %vm490_vm0, %v483_v44  ;;  %509 = vst.msk [vmem:[%s661_s23 + $0x24] sm:$0x3] %vm490_vm0, %v484_v45  ;;  %v485_v52 = vadd.f32 %v425_v46, %v188_v40 }
  0x29   : > { %511 = vst.msk [vmem:[%s661_s23 + $0x28] sm:$0x3] %vm490_vm0, %v486_v49  ;;  %v487_v54 = vadd.f32 %v433_v5, %v190_v47  ;;  %v441_v56 = vrot.slane %v345_v51, %v648_v8 }
  0x2a   : > { %v488_v55 = vadd.f32 %v437_v50, %v191_v48  ;;  %510 = vst.msk [vmem:[%s661_s23 + $0x26] sm:$0x3] %vm490_vm0, %v485_v52 }
  0x2b   : > { %512 = vst.msk [vmem:[%s661_s23 + $0x2a] sm:$0x3] %vm490_vm0, %v487_v54  ;;  %v489_v57 = vadd.f32 %v441_v56, %v192_v53 }
  0x2c   : > { %513 = vst.msk [vmem:[%s661_s23 + $0x2c] sm:$0x3] %vm490_vm0, %v488_v55 }
  0x2d   : > { %514 = vst.msk [vmem:[%s661_s23 + $0x2e] sm:$0x3] %vm490_vm0, %v489_v57 }
  0x2e PF: > { %s12_s9 = sadd.s32 1, %s608_s9  }
  0x2f   : > { %p9_p5 = scmp.ge.s32.totalorder %s12_s9, 6  }
  0x31   :  { %11 = sbr.rel (!%p9_p5) target bundleno = 1 (0x1), region = 61 }

</bundles_post_ra>
